<compile_context>
chip_gen: v7x
topology: tpu7x:2x2x1
jax: 0.10.0
libtpu: 0.0.40
codegen_flags: <defaults>
</compile_context>

<pallas_src>
import functools
import math

import jax
import jax.numpy as jnp
from jax.experimental import pallas as pl
from jax.experimental.pallas import tpu as pltpu


def _round_up(x, m):
    return (x + m - 1) // m * m


def partition_linear_kernel(x_ref, w_ref, p_ref, b_ref, o_ref):
    """One (b-tile, n-tile, k-tile) grid step of y = x @ (w * p).T + b.

    w_ref / p_ref arrive pre-transposed as (tk, tn), so the contraction is the
    canonical [tb, tk] x [tk, tn] MXU form (no in-kernel transpose).
    """
    k = pl.program_id(2)

    # Output block index is constant across the (serial) K axis, so o_ref is
    # resident in VMEM and doubles as the f32 accumulator.
    @pl.when(k == 0)
    def _init():
        o_ref[...] = jnp.zeros_like(o_ref)

    # Partition mask on the VPU: compare+select (exact, one VALU op per vreg,
    # no int8->f32 convert+multiply).
    t = jnp.where(p_ref[...] != 0, w_ref[...], 0).astype(jnp.float32)

    o_ref[...] += jnp.dot(x_ref[...], t, preferred_element_type=jnp.float32)

    @pl.when(k == pl.num_programs(2) - 1)
    def _finalize():
        # Bias added exactly once per output tile, on the last reduction step.
        o_ref[...] += b_ref[...]


def prepare_params(weight, partitions, bias=None, *,
                   tn_max=512, tk_max=512, weight_dtype=jnp.float32):
    """One-time parameter prep: pad, cast, and pre-transpose to (M_pad, N_pad).

    weight/partitions: (N, M); bias: (N,) or None.
    Returns a dict consumed by `partition_layer`.
    """
    N, M = weight.shape

    # Lane-dense tiles: multiples of 128 (covers the 256-wide v6e/v7x MXU once
    # real sizes allow 256/512-wide tiles; 128 granularity matches v5e's MXU).
    tn = min(tn_max, _round_up(N, 128))
    tk = min(tk_max, _round_up(M, 128))
    N_pad = _round_up(N, tn)
    M_pad = _round_up(M, tk)

    # Zero-padding keeps the math exact: padded K rows contribute 0 to the dot
    # product, padded N columns are sliced off at the end.
    w_t = jnp.zeros((M_pad, N_pad), weight_dtype).at[:M, :N].set(
        weight.T.astype(weight_dtype))
    p_t = jnp.zeros((M_pad, N_pad), jnp.int8).at[:M, :N].set(
        (partitions != 0).astype(jnp.int8).T)
    if bias is None:
        b_p = jnp.zeros((1, N_pad), jnp.float32)
    else:
        b_p = jnp.zeros((1, N_pad), jnp.float32).at[0, :N].set(
            bias.astype(jnp.float32))

    return dict(w_t=w_t, p_t=p_t, b=b_p, N=N, M=M,
                N_pad=N_pad, M_pad=M_pad, tn=tn, tk=tk)


@functools.partial(jax.jit, static_argnames=("N", "M", "N_pad", "M_pad",
                                             "tn", "tk", "tb_max"))
def _partition_layer_2d(x2d, w_t, p_t, b_p, *, N, M, N_pad, M_pad, tn, tk,
                        tb_max=256):
    B = x2d.shape[0]
    # f32 x: 8-row sublane granularity is enough (round to 16/32 if x goes
    # bf16/int8 later).
    tb = min(tb_max, _round_up(max(B, 1), 8))
    B_pad = _round_up(max(B, 1), tb)

    if (B_pad, M_pad) != x2d.shape:
        x_p = jnp.zeros((B_pad, M_pad), jnp.float32).at[:B, :M].set(
            x2d.astype(jnp.float32))
    else:
        x_p = x2d.astype(jnp.float32)

    grid = (B_pad // tb, N_pad // tn, M_pad // tk)

    out = pl.pallas_call(
        partition_linear_kernel,
        out_shape=jax.ShapeDtypeStruct((B_pad, N_pad), jnp.float32),
        grid_spec=pltpu.PrefetchScalarGridSpec(
            num_scalar_prefetch=0,
            grid=grid,
            in_specs=[
                pl.BlockSpec((tb, tk), lambda b, n, k: (b, k)),  # x tile
                pl.BlockSpec((tk, tn), lambda b, n, k: (k, n)),  # weight.T tile
                pl.BlockSpec((tk, tn), lambda b, n, k: (k, n)),  # mask.T tile
                pl.BlockSpec((1, tn), lambda b, n, k: (0, n)),   # bias per N tile
            ],
            out_specs=pl.BlockSpec((tb, tn), lambda b, n, k: (b, n)),
        ),
        compiler_params=pltpu.CompilerParams(
            # K is a serial reduction (accumulator in o_ref); B/N tiles are
            # independent and can be split across TensorCores.
            dimension_semantics=("parallel", "parallel", "arbitrary"),
            # Sized for v7x's 64 MiB physical VMEM; default tiles double-buffer
            # to well under this on all generations.
            vmem_limit_bytes=48 << 20,
        ),
    )(x_p, w_t, p_t, b_p)

    return out[:B, :N]


def partition_layer(x, params):
    """y = F.linear(x, weight * partitions, bias) via the Pallas kernel.

    x: (..., M) f32; params: output of prepare_params. Returns (..., N) f32.
    """
    orig_shape = x.shape
    M = orig_shape[-1]
    assert M == params["M"], "input feature dim mismatch"
    x2d = x.reshape(-1, M)
    y = _partition_layer_2d(
        x2d, params["w_t"], params["p_t"], params["b"],
        N=params["N"], M=params["M"], N_pad=params["N_pad"],
        M_pad=params["M_pad"], tn=params["tn"], tk=params["tk"])
    return y.reshape(*orig_shape[:-1], params["N"])


def init_params(key, m, n):
    """Deterministic init matching nn.Module.__init__ / reset_parameters."""
    kw, kb, kp = jax.random.split(key, 3)
    # kaiming_uniform_(a=sqrt(5)) on an (n, m) weight -> bound = 1/sqrt(fan_in)
    gain = math.sqrt(2.0 / (1.0 + 5.0))
    w_bound = gain * math.sqrt(3.0 / m)
    weight = jax.random.uniform(kw, (n, m), jnp.float32, -w_bound, w_bound)
    # bias uniform(-1/sqrt(fan_in), 1/sqrt(fan_in))
    b_bound = 1.0 / math.sqrt(m)
    bias = jax.random.uniform(kb, (n,), jnp.float32, -b_bound, b_bound)
    # partitions: a fixed binary {0,1} mask of the same (n, m) shape
    partitions = jax.random.bernoulli(kp, 0.5, (n, m)).astype(jnp.float32)
    return weight, partitions, bias


if __name__ == "__main__":
    key = jax.random.PRNGKey(0)
    kx, kparams = jax.random.split(key)

    B, M, N = 8, 32, 16   # input_shape = (m, n) = (32, 16); batch = 8
    x = jax.random.normal(kx, (B, M), dtype=jnp.float32)
    weight, partitions, bias = init_params(kparams, M, N)

    # One-time parameter prep (pad + cast + pre-transpose), then apply.
    params = prepare_params(weight, partitions, bias)
    y = jax.block_until_ready(partition_layer(x, params))

    # Reference in plain JAX: F.linear(x, weight * partitions, bias).
    y_ref = x @ (weight * partitions).T + bias
    assert y.shape == (B, N)
    assert jnp.allclose(y, y_ref, atol=1e-5, rtol=1e-5), "mismatch vs reference"

    # Also exercise a non-2D input and the no-bias path, like F.linear allows.
    params_nb = prepare_params(weight, partitions, None)
    x3 = jax.random.normal(kx, (2, 4, M), dtype=jnp.float32)
    y3 = jax.block_until_ready(partition_layer(x3, params_nb))
    y3_ref = x3 @ (weight * partitions).T
    assert y3.shape == (2, 4, N)
    assert jnp.allclose(y3, y3_ref, atol=1e-5, rtol=1e-5), "mismatch (3D/no-bias)"

    print("KERNEL_OK")
</pallas_src>

<mosaic_0001>
module attributes {stable_mosaic.version = 11 : i64} {
  func.func @partition_linear_kernel(%arg0: i32, %arg1: i32, %arg2: i32, %arg3: memref<8x128xf32, #tpu.memory_space<vmem>>, %arg4: memref<128x128xf32, #tpu.memory_space<vmem>>, %arg5: memref<128x128xi8, #tpu.memory_space<vmem>>, %arg6: memref<1x128xf32, #tpu.memory_space<vmem>>, %arg7: memref<8x128xf32, #tpu.memory_space<vmem>>) attributes {dimension_semantics = [#tpu.dimension_semantics<parallel>, #tpu.dimension_semantics<parallel>, #tpu.dimension_semantics<arbitrary>], iteration_bounds = array<i64: 1, 1, 1>, scalar_prefetch = 0 : i64, scratch_operands = 0 : i64, tpu.core_type = #tpu.core_type<tc>, window_params = [{transform_indices = @transform_0, window_bounds = array<i64: 8, 128>}, {transform_indices = @transform_1, window_bounds = array<i64: 128, 128>}, {transform_indices = @transform_2, window_bounds = array<i64: 128, 128>}, {transform_indices = @transform_3, window_bounds = array<i64: 1, 128>}, {transform_indices = @transform_4, window_bounds = array<i64: 8, 128>}]} {
    %c0_i32 = arith.constant 0 : i32
    %0 = arith.cmpi eq, %arg2, %c0_i32 : i32
    %1 = arith.extui %0 : i1 to i32
    %c0_i32_0 = arith.constant 0 : i32
    %2 = arith.cmpi ne, %1, %c0_i32_0 : i32
    scf.if %2 {
      %cst_13 = arith.constant 0.000000e+00 : f32
      %18 = vector.broadcast %cst_13 : f32 to vector<8x128xf32>
      %c0_14 = arith.constant 0 : index
      %c0_15 = arith.constant 0 : index
      %19 = vector.load %arg7[%c0_14, %c0_15] : memref<8x128xf32, #tpu.memory_space<vmem>>, vector<8x128xf32>
      tpu.vector_store %arg7[%c0_14, %c0_15], %18 {strides = array<i32>} : memref<8x128xf32, #tpu.memory_space<vmem>>, vector<8x128xf32>,
    } else {
    }
    %c0 = arith.constant 0 : index
    %c0_1 = arith.constant 0 : index
    %3 = vector.load %arg5[%c0, %c0_1] : memref<128x128xi8, #tpu.memory_space<vmem>>, vector<128x128xi8>
    %c0_i8 = arith.constant 0 : i8
    %4 = vector.broadcast %c0_i8 : i8 to vector<128x128xi8>
    %5 = arith.cmpi ne, %3, %4 : vector<128x128xi8>
    %c0_2 = arith.constant 0 : index
    %c0_3 = arith.constant 0 : index
    %6 = vector.load %arg4[%c0_2, %c0_3] : memref<128x128xf32, #tpu.memory_space<vmem>>, vector<128x128xf32>
    %c0_i32_4 = arith.constant 0 : i32
    %7 = arith.sitofp %c0_i32_4 : i32 to f32
    %8 = vector.broadcast %7 : f32 to vector<128x128xf32>
    %9 = arith.select %5, %6, %8 : vector<128x128xi1>, vector<128x128xf32>
    %c0_5 = arith.constant 0 : index
    %c0_6 = arith.constant 0 : index
    %10 = vector.load %arg7[%c0_5, %c0_6] : memref<8x128xf32, #tpu.memory_space<vmem>>, vector<8x128xf32>
    %c0_7 = arith.constant 0 : index
    %c0_8 = arith.constant 0 : index
    %11 = vector.load %arg3[%c0_7, %c0_8] : memref<8x128xf32, #tpu.memory_space<vmem>>, vector<8x128xf32>
    %cst = arith.constant dense<0.000000e+00> : vector<8x128xf32>
    %12 = tpu.matmul %11, %9, %cst {dimension_numbers = #tpu.dot_dimension_numbers<[1], [0], [0], [1], [0, 0, 1, 1], [], []>} : vector<8x128xf32>, vector<128x128xf32>, vector<8x128xf32> -> vector<8x128xf32>
    %13 = arith.addf %10, %12 : vector<8x128xf32>
    %c0_9 = arith.constant 0 : index
    %c0_10 = arith.constant 0 : index
    %14 = vector.load %arg7[%c0_9, %c0_10] : memref<8x128xf32, #tpu.memory_space<vmem>>, vector<8x128xf32>
    tpu.vector_store %arg7[%c0_9, %c0_10], %13 {strides = array<i32>} : memref<8x128xf32, #tpu.memory_space<vmem>>, vector<8x128xf32>,
    %c0_i32_11 = arith.constant 0 : i32
    %15 = arith.cmpi eq, %arg2, %c0_i32_11 : i32
    %16 = arith.extui %15 : i1 to i32
    %c0_i32_12 = arith.constant 0 : i32
    %17 = arith.cmpi ne, %16, %c0_i32_12 : i32
    scf.if %17 {
      %c0_13 = arith.constant 0 : index
      %c0_14 = arith.constant 0 : index
      %18 = vector.load %arg7[%c0_13, %c0_14] : memref<8x128xf32, #tpu.memory_space<vmem>>, vector<8x128xf32>
      %c0_15 = arith.constant 0 : index
      %c0_16 = arith.constant 0 : index
      %19 = vector.load %arg6[%c0_15, %c0_16] : memref<1x128xf32, #tpu.memory_space<vmem>>, vector<1x128xf32>
      %20 = vector.broadcast %19 : vector<1x128xf32> to vector<8x128xf32>
      %21 = arith.addf %18, %20 : vector<8x128xf32>
      %c0_17 = arith.constant 0 : index
      %c0_18 = arith.constant 0 : index
      %22 = vector.load %arg7[%c0_17, %c0_18] : memref<8x128xf32, #tpu.memory_space<vmem>>, vector<8x128xf32>
      tpu.vector_store %arg7[%c0_17, %c0_18], %21 {strides = array<i32>} : memref<8x128xf32, #tpu.memory_space<vmem>>, vector<8x128xf32>,
    } else {
    }
    return
  }
  func.func @transform_0(%arg0: i32, %arg1: i32, %arg2: i32) -> (i32, i32) {
    %c0_i32 = arith.constant 0 : i32
    return %arg0, %arg2 : i32, i32
  }
  func.func @transform_1(%arg0: i32, %arg1: i32, %arg2: i32) -> (i32, i32) {
    %c0_i32 = arith.constant 0 : i32
    return %arg2, %arg1 : i32, i32
  }
  func.func @transform_2(%arg0: i32, %arg1: i32, %arg2: i32) -> (i32, i32) {
    %c0_i32 = arith.constant 0 : i32
    return %arg2, %arg1 : i32, i32
  }
  func.func @transform_3(%arg0: i32, %arg1: i32, %arg2: i32) -> (i32, i32) {
    %c0_i32 = arith.constant 0 : i32
    %c0_i32_0 = arith.constant 0 : i32
    return %c0_i32, %arg1 : i32, i32
  }
  func.func @transform_4(%arg0: i32, %arg1: i32, %arg2: i32) -> (i32, i32) {
    %c0_i32 = arith.constant 0 : i32
    return %arg0, %arg1 : i32, i32
  }
}

</mosaic_0001>

<bundles_post_ra>
// kernel: _partition_layer_2d.1
= control target key start
LH: loop header
LB: loop body
LE: loop exit
PB: predicated region body
PF: predicated region fallthrough
CT: control target
= control target key end

     0   :  { %9 = vsyncpa [#allocation3], 0  ;;  %s638_s0 = inlined_call_operand.vmem [shape: f32[8,128], index: 0, kind: input, shape index: {}]   ;;  %s639_s1 = inlined_call_operand.hbm [shape: f32[128,128], index: 1, kind: input, shape index: {}]   ;;  %s640_s2 = inlined_call_operand.vmem [shape: s8[128,128], index: 2, kind: input, shape index: {}]   ;;  %s641_s3 = inlined_call_operand.vmem [shape: f32[1,128], index: 3, kind: input, shape index: {}]   ;;  %s642_s4 = inlined_call_operand.hbm [shape: f32[8,128], index: 4, kind: output, shape index: {}]  }
   0x1   :  { %10 = vsyncpa [#allocation4], 0  ;;  %s454_s15 = smov [#allocation2]   ;;  %s406_s19 = scalar_lea.hbm %s639_s1, 2048 }
   0x2   :  { %s18_s16 = sshll.u32 %s454_s15, 4  ;;  %p407_p0 = scmp.ne.s32.totalorder %s639_s1, %s406_s19  ;;  %s19_s16 = int_to_ptr.vmem [resolvable:$true] %s18_s16 }
   0x3   :  { %p410_p1 = scmp.lt.u32.totalorder %s406_s19, %s639_s1 }
   0x5   :  { %p412_p2 = pnand %p410_p1, %p407_p0 }
   0x7   :  { %415 = shalt.err (!%p412_p2)
}
   0x8   :  { %s416_s24 = scalar_lea.vmem %s19_s16, 2048  ;;  %p421_p4 = scmp.lt.s32.totalorder %s19_s16, %s19_s16 }
   0x9   :  { %p417_p3 = scmp.ne.s32.totalorder %s19_s16, %s416_s24  ;;  %p422_p5 = scmp.lt.s32.totalorder %s416_s24, %s416_s24 }
   0xb   :  { %p423_p6 = por %p422_p5, %p421_p4 }
   0xd   :  { %p424_p7 = pnand %p423_p6, %p417_p3 }
   0xf   :  { %427 = shalt.err (!%p424_p7)
}
  0x10   :  { %s455_s25 = smov 128   ;;  %s456_s26 = smov 8  }
  0x11   :  { %24 = dma.hbm_to_vmem [thread:$0]  %s639_s1, 2048, %s19_s16, [#allocation3], %s455_s25, %s455_s25, %s456_s26  }
  0x12   :  { %450 = dma.done.wait [#allocation3], 2048  }
  0x13   :  { %451 = vsyncadd [#allocation3], 4294965248  ;;  %v457_v0 = vmov 0.0|0.0   ;;  %vm458_vm0 = vmmov 0   ;;  %v459_v1 = vmov 0.0   ;;  %v39_v2 = vld [vmem:[%s640_s2] sm:$0xff] }
  0x14   :  { %366 = vmatprep.subr.bf16.mxu0 %v457_v0  ;;  %363 = vmatprep.mubr.msk.f32.mxu0 %vm458_vm0, %v459_v1  ;;  %v47_v3 = vld [vmem:[#allocation2] sm:$0xff]  ;;  %v48_v4 = vld [vmem:[#allocation2 + $0x8] sm:$0xff]  ;;  %vm43_vm1 = vnez %v39_v2  ;;  %v503_v5 = vld [vmem:[#allocation2 + $0x10] sm:$0xff]  ;;  %v460_v8 = vmov 0   ;;  %s461_s13 = smov [#allocation5]  }
  0x15   :  { %v505_v6 = vld [vmem:[#allocation2 + $0x18] sm:$0xff]  ;;  %v40_v7 = vld [vmem:[%s640_s2 + $0x8] sm:$0xff]  ;;  %v63_v9 = vsel %vm43_vm1, 16843009, %v460_v8  ;;  %v41_v14 = vld [vmem:[%s640_s2 + $0x10] sm:$0xff]  ;;  %v367_v15 = vpack.c.bf16 %v48_v4, %v47_v3  ;;  %s288_s14 = sshll.u32 %s461_s13, 4  ;;  %s289_s14 = int_to_ptr.vmem [resolvable:$true] %s288_s14 }
  0x16   :  { %vm44_vm2 = vnez %v40_v7  ;;  %v67_v10 = vunpack.c.0.s8 %v63_v9  ;;  %v68_v11 = vunpack.c.1.s8 %v63_v9  ;;  %v69_v12 = vunpack.c.2.s8 %v63_v9  ;;  %v51_v43 = vld [vmem:[#allocation2 + $0x20] sm:$0xff]  ;;  %v52_v44 = vld [vmem:[#allocation2 + $0x28] sm:$0xff]  ;;  %v53_v54 = vld [vmem:[#allocation2 + $0x30] sm:$0xff]  ;;  %s428_s15 = scalar_lea.vmem %s289_s14, 128  ;;  %p433_p9 = scmp.lt.s32.totalorder %s289_s14, %s289_s14 }
  0x17   :  { %v70_v13 = vunpack.c.3.s8 %v63_v9  ;;  %v371_v16 = vpack.c.bf16 %v505_v6, %v503_v5  ;;  %v64_v17 = vsel %vm44_vm2, 16843009, %v460_v8  ;;  %vm45_vm3 = vnez %v41_v14  ;;  %v54_v55 = vld [vmem:[#allocation2 + $0x38] sm:$0xff]  ;;  %v543_v60 = vld [vmem:[#allocation2 + $0x40] sm:$0xff]  ;;  %v545_v61 = vld [vmem:[#allocation2 + $0x48] sm:$0xff]  ;;  %p429_p8 = scmp.ne.s32.totalorder %s289_s14, %s428_s15  ;;  %p434_p10 = scmp.lt.s32.totalorder %s428_s15, %s428_s15 }
  0x18   :  { %v83_v18 = vpack.c.b16 %v67_v10, %v67_v10  ;;  %v85_v19 = vpack.c.b16 %v68_v11, %v68_v11  ;;  %v87_v20 = vpack.c.b16 %v69_v12, %v69_v12  ;;  %v71_v22 = vunpack.c.0.s8 %v64_v17  ;;  %v42_v3 = vld [vmem:[%s640_s2 + $0x18] sm:$0xff] }
  0x19   :  { %v89_v21 = vpack.c.b16 %v70_v13, %v70_v13  ;;  %v72_v23 = vunpack.c.1.s8 %v64_v17  ;;  %v73_v24 = vunpack.c.2.s8 %v64_v17  ;;  %v74_v25 = vunpack.c.3.s8 %v64_v17  ;;  %p435_p11 = por %p434_p10, %p433_p9 }
  0x1a   :  { %v84_v26 = vpack.c.b8 %v83_v18, %v83_v18  ;;  %v86_v27 = vpack.c.b8 %v85_v19, %v85_v19  ;;  %v88_v28 = vpack.c.b8 %v87_v20, %v87_v20  ;;  %v91_v30 = vpack.c.b16 %v71_v22, %v71_v22 }
  0x1b   :  { %v90_v29 = vpack.c.b8 %v89_v21, %v89_v21  ;;  %v93_v31 = vpack.c.b16 %v72_v23, %v72_v23  ;;  %v95_v32 = vpack.c.b16 %v73_v24, %v73_v24  ;;  %v97_v33 = vpack.c.b16 %v74_v25, %v74_v25  ;;  %p436_p12 = pnand %p435_p11, %p429_p8 }
  0x1c   :  { %vm115_vm4 = vnez %v84_v26  ;;  %vm116_vm5 = vnez %v86_v27  ;;  %vm117_vm6 = vnez %v88_v28  ;;  %v92_v37 = vpack.c.b8 %v91_v30, %v91_v30 }
  0x1d   :  { %vm118_vm7 = vnez %v90_v29  ;;  %v131_v34 = vsel %vm115_vm4, 16843009, %v460_v8  ;;  %v132_v35 = vsel %vm116_vm5, 16843009, %v460_v8  ;;  %v133_v36 = vsel %vm117_vm6, 16843009, %v460_v8 }
  0x1e   :  { %v147_v38 = vunpack.c.0.s8 %v131_v34  ;;  %v148_v39 = vunpack.c.0.s8 %v132_v35  ;;  %v134_v40 = vsel %vm118_vm7, 16843009, %v460_v8  ;;  %v149_v41 = vunpack.c.0.s8 %v133_v36 }
  0x1f   :  { %v150_v42 = vunpack.c.0.s8 %v134_v40  ;;  %v94_v45 = vpack.c.b8 %v93_v31, %v93_v31  ;;  %vm119_vm8 = vnez %v92_v37  ;;  %v96_v46 = vpack.c.b8 %v95_v32, %v95_v32 }
  0x20   :  { %vm163_vm9 = vcmp.ne.s32.totalorder %v147_v38, 0  ;;  %vm164_vm10 = vcmp.ne.s32.totalorder %v148_v39, 0  ;;  %vm521_vm11 = vcmp.ne.s32.totalorder %v149_v41, 0  ;;  %v135_v48 = vsel %vm119_vm8, 16843009, %v460_v8  ;;  %v57_v38 = vld [vmem:[#allocation2 + $0x50] sm:$0xff] }
  0x21   :  { %vm368_vm12 = vmpackc.low %vm164_vm10, %vm163_vm9  ;;  %vm526_vm13 = vcmp.ne.s32.totalorder %v150_v42, 0  ;;  %vm120_vm14 = vnez %v94_v45  ;;  %v151_v50 = vunpack.c.0.s8 %v135_v48  ;;  %v98_v51 = vpack.c.b8 %v97_v33, %v97_v33  ;;  %v58_v39 = vld [vmem:[#allocation2 + $0x58] sm:$0xff] }
  0x22   :  { %369 = vmatpush3.bf16.msk.msra.mxu0 %vm368_vm12, %v367_v15  ;;  %v136_v52 = vsel %vm120_vm14, 16843009, %v460_v8  ;;  %v375_v53 = vpack.c.bf16 %v52_v44, %v51_v43  ;;  %vm121_vm15 = vnez %v96_v46  ;;  %v65_v56 = vsel %vm45_vm3, 16843009, %v460_v8  ;;  %vm372_vm0 = vmpackc.low %vm526_vm13, %vm521_vm11 }
  0x23   :  { %370 = vmatprep.subr.bf16.mxu0 %v457_v0  ;;  %v152_v57 = vunpack.c.0.s8 %v136_v52  ;;  %vm538_vm1 = vcmp.ne.s32.totalorder %v151_v50, 0  ;;  %vm122_vm2 = vnez %v98_v51  ;;  %v137_v59 = vsel %vm121_vm15, 16843009, %v460_v8  ;;  %v59_v51 = vld [vmem:[#allocation2 + $0x60] sm:$0xff]  ;;  %v60_v52 = vld [vmem:[#allocation2 + $0x68] sm:$0xff] }
  0x24   :  { %v138_v62 = vsel %vm122_vm2, 16843009, %v460_v8  ;;  %v153_v63 = vunpack.c.0.s8 %v137_v59  ;;  %v75_v1 = vunpack.c.0.s8 %v65_v56  ;;  %v76_v2 = vunpack.c.1.s8 %v65_v56 }
  0x25   :  { %vm551_vm3 = vcmp.ne.s32.totalorder %v152_v57, 0  ;;  %v154_v7 = vunpack.c.0.s8 %v138_v62  ;;  %v77_v9 = vunpack.c.2.s8 %v65_v56  ;;  %v78_v10 = vunpack.c.3.s8 %v65_v56 }
  0x26   :  { %373 = vmatpush3.bf16.msk.msra.mxu0 %vm372_vm0, %v371_v16  ;;  %v379_v11 = vpack.c.bf16 %v54_v55, %v53_v54  ;;  %v99_v12 = vpack.c.b16 %v75_v1, %v75_v1  ;;  %v101_v13 = vpack.c.b16 %v76_v2, %v76_v2  ;;  %v383_v14 = vpack.c.bf16 %v545_v61, %v543_v60  ;;  %vm376_vm4 = vmpackc.low %vm551_vm3, %vm538_vm1  ;;  %v61_v60 = vld [vmem:[#allocation2 + $0x70] sm:$0xff]  ;;  %v62_v61 = vld [vmem:[#allocation2 + $0x78] sm:$0xff] }
  0x27   :  { %374 = vmatprep.subr.bf16.mxu0 %v457_v0  ;;  %vm570_vm5 = vcmp.ne.s32.totalorder %v153_v63, 0  ;;  %v103_v6 = vpack.c.b16 %v77_v9, %v77_v9  ;;  %v105_v15 = vpack.c.b16 %v78_v10, %v78_v10  ;;  %vm46_vm6 = vnez %v42_v3  ;;  %v313_v1 = vld [vmem:[%s641_s3] ss:$0 sm:$0xff] }
  0x28   :  { %vm574_vm7 = vcmp.ne.s32.totalorder %v154_v7, 0  ;;  %v100_v17 = vpack.c.b8 %v99_v12, %v99_v12  ;;  %v102_v18 = vpack.c.b8 %v101_v13, %v101_v13  ;;  %v66_v19 = vsel %vm46_vm6, 16843009, %v460_v8 }
  0x29   :  { %v104_v20 = vpack.c.b8 %v103_v6, %v103_v6  ;;  %v106_v21 = vpack.c.b8 %v105_v15, %v105_v15  ;;  %v79_v22 = vunpack.c.0.s8 %v66_v19  ;;  %v80_v23 = vunpack.c.1.s8 %v66_v19  ;;  %vm380_vm10 = vmpackc.low %vm574_vm7, %vm570_vm5 }
  0x2a   :  { %377 = vmatpush3.bf16.msk.msra.mxu0 %vm376_vm4, %v375_v53  ;;  %vm123_vm8 = vnez %v100_v17  ;;  %vm124_vm9 = vnez %v102_v18  ;;  %v81_v24 = vunpack.c.2.s8 %v66_v19  ;;  %v82_v25 = vunpack.c.3.s8 %v66_v19 }
  0x2b   :  { %378 = vmatprep.subr.bf16.mxu0 %v457_v0  ;;  %v139_v26 = vsel %vm123_vm8, 16843009, %v460_v8  ;;  %v140_v27 = vsel %vm124_vm9, 16843009, %v460_v8  ;;  %vm125_vm11 = vnez %v104_v20  ;;  %vm126_vm12 = vnez %v106_v21 }
  0x2c   :  { %v155_v28 = vunpack.c.0.s8 %v139_v26  ;;  %v156_v29 = vunpack.c.0.s8 %v140_v27  ;;  %v141_v30 = vsel %vm125_vm11, 16843009, %v460_v8  ;;  %v142_v31 = vsel %vm126_vm12, 16843009, %v460_v8 }
  0x2d   :  { %v157_v32 = vunpack.c.0.s8 %v141_v30  ;;  %v158_v33 = vunpack.c.0.s8 %v142_v31  ;;  %v107_v34 = vpack.c.b16 %v79_v22, %v79_v22  ;;  %v109_v35 = vpack.c.b16 %v80_v23, %v80_v23 }
  0x2e   :  { %381 = vmatpush3.bf16.msk.msra.mxu0 %vm380_vm10, %v379_v11  ;;  %vm588_vm13 = vcmp.ne.s32.totalorder %v155_v28, 0  ;;  %vm592_vm14 = vcmp.ne.s32.totalorder %v156_v29, 0  ;;  %v111_v40 = vpack.c.b16 %v81_v24, %v81_v24  ;;  %v113_v41 = vpack.c.b16 %v82_v25, %v82_v25 }
  0x2f   :  { %382 = vmatprep.subr.bf16.mxu0 %v457_v0  ;;  %vm384_vm15 = vmpackc.low %vm592_vm14, %vm588_vm13  ;;  %v108_v42 = vpack.c.b8 %v107_v34, %v107_v34  ;;  %v110_v43 = vpack.c.b8 %v109_v35, %v109_v35  ;;  %vm601_vm0 = vcmp.ne.s32.totalorder %v157_v32, 0  ;;  %vm605_vm1 = vcmp.ne.s32.totalorder %v158_v33, 0 }
  0x30   :  { %v112_v46 = vpack.c.b8 %v111_v40, %v111_v40  ;;  %v114_v47 = vpack.c.b8 %v113_v41, %v113_v41  ;;  %v387_v48 = vpack.c.bf16 %v58_v39, %v57_v38  ;;  %vm388_vm6 = vmpackc.low %vm605_vm1, %vm601_vm0  ;;  %v391_v59 = vpack.c.bf16 %v60_v52, %v59_v51 }
  0x31   :  { %vm127_vm2 = vnez %v108_v42  ;;  %vm128_vm3 = vnez %v110_v43  ;;  %v395_v62 = vpack.c.bf16 %v62_v61, %v61_v60 }
  0x32   :  { %385 = vmatpush3.bf16.msk.msra.mxu0 %vm384_vm15, %v383_v14  ;;  %v143_v49 = vsel %vm127_vm2, 16843009, %v460_v8  ;;  %v144_v50 = vsel %vm128_vm3, 16843009, %v460_v8  ;;  %vm129_vm4 = vnez %v112_v46  ;;  %vm130_vm5 = vnez %v114_v47 }
  0x33   :  { %386 = vmatprep.subr.bf16.mxu0 %v457_v0  ;;  %v159_v53 = vunpack.c.0.s8 %v143_v49  ;;  %v160_v54 = vunpack.c.0.s8 %v144_v50  ;;  %v145_v55 = vsel %vm129_vm4, 16843009, %v460_v8  ;;  %v146_v56 = vsel %vm130_vm5, 16843009, %v460_v8  ;;  %v196_v8 = vld [vmem:[%s638_s0] sm:$0xff] }
  0x34   :  { %v161_v57 = vunpack.c.0.s8 %v145_v55  ;;  %v162_v58 = vunpack.c.0.s8 %v146_v56 }
  0x35   :  { %vm175_vm7 = vcmp.ne.s32.totalorder %v159_v53, 0  ;;  %vm176_vm8 = vcmp.ne.s32.totalorder %v160_v54, 0 }
  0x36   :  { %389 = vmatpush3.bf16.msk.msra.mxu0 %vm388_vm6, %v387_v48  ;;  %vm392_vm9 = vmpackc.low %vm176_vm8, %vm175_vm7  ;;  %vm177_vm10 = vcmp.ne.s32.totalorder %v161_v57, 0  ;;  %vm178_vm11 = vcmp.ne.s32.totalorder %v162_v58, 0 }
  0x37   :  { %390 = vmatprep.subr.bf16.mxu0 %v457_v0  ;;  %vm396_vm12 = vmpackc.low %vm178_vm11, %vm177_vm10 }
  0x3a   :  { %393 = vmatpush3.bf16.msk.msra.mxu0 %vm392_vm9, %v391_v59 }
  0x3b   :  { %394 = vmatprep.subr.bf16.mxu0 %v457_v0 }
  0x3e   :  { %397 = vmatpush3.bf16.msk.msra.mxu0 %vm396_vm12, %v395_v62 }
  0x41   :  { %364 = vmatmul.mubr.f32.vlgmr.msra.gmra.mrb[0].mxu0 %v196_v8 }
 0x114   :  { %v263_v63 = vpop.f32.mrb[0].mxu0 }
 0x115   :  { %v365_v2 = vpop.f32.mrb[1].mxu0  ;;  %v280_v3 = vadd.f32 %v313_v1, %v263_v63 }
 0x117   :  { %281 = vst [vmem:[#allocation5] sm:$0xff] %v280_v3 }
 0x118   :  { %439 = shalt.err (!%p436_p12)
}
 0x119   :  { %s440_s17 = scalar_lea.hbm %s642_s4, 128 }
 0x11a   :  { %p441_p13 = scmp.ne.s32.totalorder %s642_s4, %s440_s17  ;;  %p444_p0 = scmp.lt.u32.totalorder %s440_s17, %s642_s4 }
 0x11c   :  { %p446_p1 = pnand %p444_p0, %p441_p13 }
 0x11e   :  { %449 = shalt.err (!%p446_p1)
}
 0x11f   :  { %291 = dma.vmem_to_hbm [thread:$0]  %s289_s14, 128, %s642_s4, [#allocation4]  }
 0x120   :  { %452 = dma.done.wait [#allocation4], 128  }
 0x121   :  { %453 = vsyncadd [#allocation4], 4294967168 }
 0x122   :  { %295 = vsyncpa [#allocation3], 1 }
 0x123   :  { %296 = vsyncpa [#allocation4], 1 }

</bundles_post_ra>
